<compile_context>
chip_gen: v7x
topology: tpu7x:2x2x1
jax: 0.10.0
libtpu: 0.0.40
codegen_flags: <defaults>
</compile_context>

<pallas_src>
import functools

import jax
import jax.numpy as jnp
from jax.experimental import pallas as pl
from jax.experimental.pallas import tpu as pltpu


SUBLANE = 8                       # TPU vreg sublane count
TILE_B_MAX = 2048                 # hard cap on the batch tile
VMEM_BUDGET = 40 * 1024 * 1024    # conservative budget (headroom under v7x's 64 MiB)
VPU_LAYER1_MAX_K = 8              # below this, layer 1 is cheaper on the VPU than MXU


def _cdiv(a, b):
    return -(-a // b)


def _round_up(v, m):
    return ((v + m - 1) // m) * m


def mlp_kernel(x_ref, w1_ref, b1_ref, w2_ref, b2_ref, w3_ref, b3_ref, o_ref,
               *, vpu_layer1):
    # ---- layer 1 + ReLU --------------------------------------------------
    if vpu_layer1:
        # K is tiny: unrolled broadcast FMAs on the (otherwise idle) VPU, all f32.
        x = x_ref[...].astype(jnp.float32)
        w1 = w1_ref[...].astype(jnp.float32)
        n_in = x.shape[1]
        h1 = x[:, 0:1] * w1[0:1, :]
        for k in range(1, n_in):
            h1 = h1 + x[:, k:k + 1] * w1[k:k + 1, :]
        h1 = h1 + b1_ref[...]
    else:
        # Large K: bf16 MXU pass with f32 accumulation.
        h1 = jnp.dot(x_ref[...], w1_ref[...],
                     preferred_element_type=jnp.float32) + b1_ref[...]
    h1 = jnp.maximum(h1, 0.0)

    # ---- layer 2 + ReLU (bf16 MXU, f32 accumulate / bias / ReLU) ---------
    h2 = jnp.dot(h1.astype(w2_ref.dtype), w2_ref[...],
                 preferred_element_type=jnp.float32) + b2_ref[...]
    h2 = jnp.maximum(h2, 0.0)

    # ---- output layer (no activation) ------------------------------------
    y = jnp.dot(h2.astype(w3_ref.dtype), w3_ref[...],
                preferred_element_type=jnp.float32) + b3_ref[...]
    o_ref[...] = y.astype(o_ref.dtype)


def _choose_tile_b(B, x_row_bytes, out_row_bytes, act_row_bytes, weight_bytes):
    # Double-buffered x/out tiles + f32 activations + resident weights must fit
    # the VMEM budget (sized for the smallest-VMEM generation, v7x).
    per_row = 2 * (x_row_bytes + out_row_bytes) + act_row_bytes
    avail = max(VMEM_BUDGET - weight_bytes, per_row * SUBLANE)
    t = min(TILE_B_MAX, max(SUBLANE, (avail // per_row) // SUBLANE * SUBLANE))
    # Guarantee >= 2 grid steps so v7x's second TensorCore is not idle.
    t = min(t, _round_up(_cdiv(B, 2), SUBLANE))
    return max(t, SUBLANE)


@functools.partial(jax.jit, static_argnames=("tile_b",))
def net_forward(x, params, *, tile_b=None):
    """Pallas TPU implementation of Net.forward.

    x: (B, n_in) float32
    params: w1 (n_in,n_hi1), b1 (1,n_hi1), w2 (n_hi1,n_hi2), b2 (1,n_hi2),
            w3 (n_hi2,n_out), b3 (1,n_out)   (weights transposed vs nn.Linear)
    """
    w1, b1 = params["w1"], params["b1"]
    w2, b2 = params["w2"], params["b2"]
    w3, b3 = params["w3"], params["b3"]

    B, n_in = x.shape
    n_hi1 = w1.shape[1]
    n_hi2 = w2.shape[1]
    n_out = w3.shape[1]

    # dtype policy: bf16 operands into the MXU, f32 accumulation/elementwise.
    vpu_layer1 = n_in <= VPU_LAYER1_MAX_K
    if not vpu_layer1:
        x = x.astype(jnp.bfloat16)
        w1 = w1.astype(jnp.bfloat16)
    w2 = w2.astype(jnp.bfloat16)
    w3 = w3.astype(jnp.bfloat16)

    weight_bytes = sum(int(a.size) * a.dtype.itemsize
                       for a in (w1, b1, w2, b2, w3, b3))
    x_row_bytes = n_in * x.dtype.itemsize
    out_row_bytes = n_out * 4
    act_row_bytes = 4 * (n_hi1 + n_hi2)

    if tile_b is None:
        tile_b = _choose_tile_b(B, x_row_bytes, out_row_bytes, act_row_bytes,
                                weight_bytes)
    tile_b = max(SUBLANE, _round_up(tile_b, SUBLANE))

    # No jnp.pad: Pallas masks out-of-bounds rows of the last (partial) tile.
    grid_b = _cdiv(B, tile_b)

    est_vmem = (weight_bytes
                + 2 * tile_b * (x_row_bytes + out_row_bytes)
                + tile_b * act_row_bytes)
    vmem_limit = int(min(48 * 1024 * 1024, max(16 * 1024 * 1024, 4 * est_vmem)))

    # Resident weights/biases: constant index_map -> single-buffered.
    def resident(a):
        return pl.BlockSpec(a.shape, lambda i: (0, 0),
                            pipeline_mode=pl.Buffered(1))

    kernel = functools.partial(mlp_kernel, vpu_layer1=vpu_layer1)

    out = pl.pallas_call(
        kernel,
        out_shape=jax.ShapeDtypeStruct((B, n_out), jnp.float32),
        grid=(grid_b,),
        in_specs=[
            pl.BlockSpec((tile_b, n_in), lambda i: (i, 0)),  # x: tiled on batch
            resident(w1), resident(b1),
            resident(w2), resident(b2),
            resident(w3), resident(b3),
        ],
        out_specs=pl.BlockSpec((tile_b, n_out), lambda i: (i, 0)),
        compiler_params=pltpu.CompilerParams(
            dimension_semantics=("parallel",),   # megacore sharding on v7x
            vmem_limit_bytes=vmem_limit,
        ),
    )(x, w1, b1, w2, b2, w3, b3)

    return out


def init_params(key, n_in, n_hi1, n_hi2, n_out):
    """Deterministic init mimicking nn.Linear's U(-1/sqrt(fan_in), +...)."""
    ks = jax.random.split(key, 6)

    def linear(kw, kb, fan_in, fan_out):
        bound = 1.0 / jnp.sqrt(jnp.float32(fan_in))
        w = jax.random.uniform(kw, (fan_in, fan_out), jnp.float32, -bound, bound)
        b = jax.random.uniform(kb, (1, fan_out), jnp.float32, -bound, bound)
        return w, b

    w1, b1 = linear(ks[0], ks[1], n_in, n_hi1)
    w2, b2 = linear(ks[2], ks[3], n_hi1, n_hi2)
    w3, b3 = linear(ks[4], ks[5], n_hi2, n_out)
    return dict(w1=w1, b1=b1, w2=w2, b2=b2, w3=w3, b3=b3)


def reference_forward(x, p):
    h1 = jnp.maximum(x @ p["w1"] + p["b1"], 0.0)
    h2 = jnp.maximum(h1 @ p["w2"] + p["b2"], 0.0)
    return h2 @ p["w3"] + p["b3"]


if __name__ == "__main__":
    # Shapes implied by the script: x is (200, 2); Net(n_in=2, n_hi1, n_hi2, n_out=2)
    B, n_in, n_hi1, n_hi2, n_out = 200, 2, 32, 32, 2

    key = jax.random.PRNGKey(0)
    kx, kp = jax.random.split(key)

    # Mimic the two-cluster data: normal(mean=+1) and normal(mean=-1), cat'ed.
    half = B // 2
    x0 = jax.random.normal(kx, (half, n_in), jnp.float32) + 1.0
    x1 = jax.random.normal(jax.random.fold_in(kx, 1), (half, n_in), jnp.float32) - 1.0
    x = jnp.concatenate([x0, x1], axis=0)

    params = init_params(kp, n_in, n_hi1, n_hi2, n_out)
    ref = reference_forward(x, params)

    # bf16 MXU operands -> loosened tolerance vs the f32 reference.
    ATOL = 5e-2
    RTOL = 5e-2

    # Default tiling: tile_b=104 -> grid=(2,), second tile partially OOB (masked).
    out = jax.block_until_ready(net_forward(x, params))
    assert out.shape == (B, n_out), out.shape
    assert jnp.allclose(out, ref, atol=ATOL, rtol=RTOL), "mismatch vs reference"

    # Explicit smaller tile: grid=(4,), last tile only 8 valid rows.
    out2 = jax.block_until_ready(net_forward(x, params, tile_b=64))
    assert out2.shape == (B, n_out), out2.shape
    assert jnp.allclose(out2, ref, atol=ATOL, rtol=RTOL), "mismatch (tiled) vs reference"

    # Ragged batch (B not a multiple of the tile): exercises OOB-masked last tile.
    Bs = 50
    out3 = jax.block_until_ready(net_forward(x[:Bs], params))
    assert out3.shape == (Bs, n_out), out3.shape
    assert jnp.allclose(out3, ref[:Bs], atol=ATOL, rtol=RTOL), "mismatch (ragged) vs reference"

    print("KERNEL_OK")
</pallas_src>

<mosaic_0001>
module attributes {stable_mosaic.version = 11 : i64} {
  func.func @mlp_kernel(%arg0: i32, %arg1: memref<104x2xf32, #tpu.memory_space<vmem>>, %arg2: memref<2x32xf32, #tpu.memory_space<vmem>>, %arg3: memref<1x32xf32, #tpu.memory_space<vmem>>, %arg4: memref<32x32xbf16, #tpu.memory_space<vmem>>, %arg5: memref<1x32xf32, #tpu.memory_space<vmem>>, %arg6: memref<32x2xbf16, #tpu.memory_space<vmem>>, %arg7: memref<1x2xf32, #tpu.memory_space<vmem>>, %arg8: memref<104x2xf32, #tpu.memory_space<vmem>>) attributes {dimension_semantics = [#tpu.dimension_semantics<parallel>], iteration_bounds = array<i64: 2>, scalar_prefetch = 0 : i64, scratch_operands = 0 : i64, tpu.core_type = #tpu.core_type<tc>, window_params = [{transform_indices = @transform_0, window_bounds = array<i64: 104, 2>}, {pipeline_mode = #tpu.pipeline_mode<synchronous>, transform_indices = @transform_1, window_bounds = array<i64: 2, 32>}, {pipeline_mode = #tpu.pipeline_mode<synchronous>, transform_indices = @transform_2, window_bounds = array<i64: 1, 32>}, {pipeline_mode = #tpu.pipeline_mode<synchronous>, transform_indices = @transform_3, window_bounds = array<i64: 32, 32>}, {pipeline_mode = #tpu.pipeline_mode<synchronous>, transform_indices = @transform_4, window_bounds = array<i64: 1, 32>}, {pipeline_mode = #tpu.pipeline_mode<synchronous>, transform_indices = @transform_5, window_bounds = array<i64: 32, 2>}, {pipeline_mode = #tpu.pipeline_mode<synchronous>, transform_indices = @transform_6, window_bounds = array<i64: 1, 2>}, {transform_indices = @transform_7, window_bounds = array<i64: 104, 2>}]} {
    %c0 = arith.constant 0 : index
    %c0_0 = arith.constant 0 : index
    %0 = vector.load %arg1[%c0, %c0_0] : memref<104x2xf32, #tpu.memory_space<vmem>>, vector<104x2xf32>
    %c0_1 = arith.constant 0 : index
    %c0_2 = arith.constant 0 : index
    %1 = vector.load %arg2[%c0_1, %c0_2] : memref<2x32xf32, #tpu.memory_space<vmem>>, vector<2x32xf32>
    %2 = vector.extract_strided_slice %0 {offsets = [0, 0], sizes = [104, 1], strides = [1, 1]} : vector<104x2xf32> to vector<104x1xf32>
    %3 = vector.extract_strided_slice %1 {offsets = [0, 0], sizes = [1, 32], strides = [1, 1]} : vector<2x32xf32> to vector<1x32xf32>
    %4 = vector.broadcast %2 : vector<104x1xf32> to vector<104x32xf32>
    %5 = vector.broadcast %3 : vector<1x32xf32> to vector<104x32xf32>
    %6 = arith.mulf %4, %5 : vector<104x32xf32>
    %7 = vector.extract_strided_slice %0 {offsets = [0, 1], sizes = [104, 1], strides = [1, 1]} : vector<104x2xf32> to vector<104x1xf32>
    %8 = vector.extract_strided_slice %1 {offsets = [1, 0], sizes = [1, 32], strides = [1, 1]} : vector<2x32xf32> to vector<1x32xf32>
    %9 = vector.broadcast %7 : vector<104x1xf32> to vector<104x32xf32>
    %10 = vector.broadcast %8 : vector<1x32xf32> to vector<104x32xf32>
    %11 = arith.mulf %9, %10 : vector<104x32xf32>
    %12 = arith.addf %6, %11 : vector<104x32xf32>
    %c0_3 = arith.constant 0 : index
    %c0_4 = arith.constant 0 : index
    %13 = vector.load %arg3[%c0_3, %c0_4] : memref<1x32xf32, #tpu.memory_space<vmem>>, vector<1x32xf32>
    %14 = vector.broadcast %13 : vector<1x32xf32> to vector<104x32xf32>
    %15 = arith.addf %12, %14 : vector<104x32xf32>
    %cst = arith.constant 0.000000e+00 : f32
    %16 = vector.broadcast %cst : f32 to vector<104x32xf32>
    %17 = arith.maximumf %15, %16 : vector<104x32xf32>
    %18 = arith.truncf %17 : vector<104x32xf32> to vector<104x32xbf16>
    %c0_5 = arith.constant 0 : index
    %c0_6 = arith.constant 0 : index
    %19 = vector.load %arg4[%c0_5, %c0_6] : memref<32x32xbf16, #tpu.memory_space<vmem>>, vector<32x32xbf16>
    %cst_7 = arith.constant dense<0.000000e+00> : vector<104x32xf32>
    %20 = tpu.matmul %18, %19, %cst_7 {dimension_numbers = #tpu.dot_dimension_numbers<[1], [0], [0], [1], [0, 0, 1, 1], [], []>} : vector<104x32xbf16>, vector<32x32xbf16>, vector<104x32xf32> -> vector<104x32xf32>
    %c0_8 = arith.constant 0 : index
    %c0_9 = arith.constant 0 : index
    %21 = vector.load %arg5[%c0_8, %c0_9] : memref<1x32xf32, #tpu.memory_space<vmem>>, vector<1x32xf32>
    %22 = vector.broadcast %21 : vector<1x32xf32> to vector<104x32xf32>
    %23 = arith.addf %20, %22 : vector<104x32xf32>
    %cst_10 = arith.constant 0.000000e+00 : f32
    %24 = vector.broadcast %cst_10 : f32 to vector<104x32xf32>
    %25 = arith.maximumf %23, %24 : vector<104x32xf32>
    %26 = arith.truncf %25 : vector<104x32xf32> to vector<104x32xbf16>
    %c0_11 = arith.constant 0 : index
    %c0_12 = arith.constant 0 : index
    %27 = vector.load %arg6[%c0_11, %c0_12] : memref<32x2xbf16, #tpu.memory_space<vmem>>, vector<32x2xbf16>
    %cst_13 = arith.constant dense<0.000000e+00> : vector<104x2xf32>
    %28 = tpu.matmul %26, %27, %cst_13 {dimension_numbers = #tpu.dot_dimension_numbers<[1], [0], [0], [1], [0, 0, 1, 1], [], []>} : vector<104x32xbf16>, vector<32x2xbf16>, vector<104x2xf32> -> vector<104x2xf32>
    %c0_14 = arith.constant 0 : index
    %c0_15 = arith.constant 0 : index
    %29 = vector.load %arg7[%c0_14, %c0_15] : memref<1x2xf32, #tpu.memory_space<vmem>>, vector<1x2xf32>
    %30 = vector.broadcast %29 : vector<1x2xf32> to vector<104x2xf32>
    %31 = arith.addf %28, %30 : vector<104x2xf32>
    %c0_16 = arith.constant 0 : index
    %c0_17 = arith.constant 0 : index
    %32 = vector.load %arg8[%c0_16, %c0_17] : memref<104x2xf32, #tpu.memory_space<vmem>>, vector<104x2xf32>
    tpu.vector_store %arg8[%c0_16, %c0_17], %31 {strides = array<i32>} : memref<104x2xf32, #tpu.memory_space<vmem>>, vector<104x2xf32>,
    return
  }
  func.func @transform_0(%arg0: i32) -> (i32, i32) {
    %c0_i32 = arith.constant 0 : i32
    %c0_i32_0 = arith.constant 0 : i32
    return %arg0, %c0_i32 : i32, i32
  }
  func.func @transform_1(%arg0: i32) -> (i32, i32) {
    %c0_i32 = arith.constant 0 : i32
    %c0_i32_0 = arith.constant 0 : i32
    %c0_i32_1 = arith.constant 0 : i32
    return %c0_i32, %c0_i32_0 : i32, i32
  }
  func.func @transform_2(%arg0: i32) -> (i32, i32) {
    %c0_i32 = arith.constant 0 : i32
    %c0_i32_0 = arith.constant 0 : i32
    %c0_i32_1 = arith.constant 0 : i32
    return %c0_i32, %c0_i32_0 : i32, i32
  }
  func.func @transform_3(%arg0: i32) -> (i32, i32) {
    %c0_i32 = arith.constant 0 : i32
    %c0_i32_0 = arith.constant 0 : i32
    %c0_i32_1 = arith.constant 0 : i32
    return %c0_i32, %c0_i32_0 : i32, i32
  }
  func.func @transform_4(%arg0: i32) -> (i32, i32) {
    %c0_i32 = arith.constant 0 : i32
    %c0_i32_0 = arith.constant 0 : i32
    %c0_i32_1 = arith.constant 0 : i32
    return %c0_i32, %c0_i32_0 : i32, i32
  }
  func.func @transform_5(%arg0: i32) -> (i32, i32) {
    %c0_i32 = arith.constant 0 : i32
    %c0_i32_0 = arith.constant 0 : i32
    %c0_i32_1 = arith.constant 0 : i32
    return %c0_i32, %c0_i32_0 : i32, i32
  }
  func.func @transform_6(%arg0: i32) -> (i32, i32) {
    %c0_i32 = arith.constant 0 : i32
    %c0_i32_0 = arith.constant 0 : i32
    %c0_i32_1 = arith.constant 0 : i32
    return %c0_i32, %c0_i32_0 : i32, i32
  }
  func.func @transform_7(%arg0: i32) -> (i32, i32) {
    %c0_i32 = arith.constant 0 : i32
    %c0_i32_0 = arith.constant 0 : i32
    return %arg0, %c0_i32 : i32, i32
  }
}

</mosaic_0001>

<bundles_post_ra>
// kernel: net_forward.1
= control target key start
LH: loop header
LB: loop body
LE: loop exit
PB: predicated region body
PF: predicated region fallthrough
CT: control target
= control target key end

     0   :  { %s1456_s24 = smov 0   ;;  %s1458_s25 = smov 0   ;;  %s1774_s0 = inlined_call_operand.vmem [shape: f32[200,2], index: 0, kind: input, shape index: {}]   ;;  %s1775_s1 = inlined_call_operand.vmem [shape: f32[2,32], index: 1, kind: input, shape index: {}]   ;;  %s1776_s2 = inlined_call_operand.vmem [shape: f32[1,32], index: 2, kind: input, shape index: {}]   ;;  %s1777_s3 = inlined_call_operand.vmem [shape: bf16[32,32], index: 3, kind: input, shape index: {}]   ;;  %s1778_s4 = inlined_call_operand.vmem [shape: f32[1,32], index: 4, kind: input, shape index: {}]   ;;  %s1779_s5 = inlined_call_operand.vmem [shape: bf16[32,2], index: 5, kind: input, shape index: {}]   ;;  %s1780_s6 = inlined_call_operand.vmem [shape: f32[1,2], index: 6, kind: input, shape index: {}]   ;;  %s1781_s7 = inlined_call_operand.vmem [shape: f32[200,2], index: 7, kind: output, shape index: {}]  }
   0x1   :  { %s1460_s26 = smov 0  }
   0x2 LB: > { %s1469_s27 = sadd.s32 4294967295, %s1378_s26   ;;  %s1471_s28 = sadd.s32 1, %s1378_s26   ;;  %s1378_s26 = sphi %s1460_s26, %s1788_s26   ;;  %s1374_s25 = sphi %s1458_s25, %s1787_s25   ;;  %s1370_s24 = sphi %s1456_s24, %s1786_s24  }
   0x3   : > { %s173_s29 = ssub.s32 %s1378_s26, %s1471_s28  ;;  %s176_s30 = sadd.s32 1, %s1374_s25 }
   0x4   : > { %p174_p0 = scmp.eq.s32.totalorder %s173_s29, 0  ;;  %p186_p1 = scmp.ne.s32.totalorder %s1374_s25, %s1370_s24 }
   0x5   : > { %p187_p2 = scmp.eq.s32.totalorder %s1469_s27, 1  ;;  %p1086_p3 = scmp.ge.s32.totalorder %s1378_s26, 1 }
   0x6   : > { %s1479_s8 = scalar_select %p174_p0, %s1374_s25, %s176_s30  }
   0x7   : > { %p1481_p4 = por %p187_p2, %p186_p1  ;;  %p246_p5 = scmp.lt.s32.totalorder %s1378_s26, 3 }
   0x9   : > { %p247_p6 = pnand %p1086_p3, %p246_p5 }
   0xa   : > { %s1486_s10 = smul.u32 (!%p247_p6), 13, %s1469_s27  ;;  %v1412_v0 = vmov (!%p247_p6), 1   ;;  %v1413_v1 = vmov (!%p247_p6), 0   ;;  %v1316_v6 = vld [vmem:[%s1777_s3] sm:$0xff] (!%p247_p6)   ;;  %v1414_v7 = vmov (!%p247_p6), 0.0   ;;  %v1317_v9 = vld [vmem:[%s1777_s3 + $0x8] sm:$0xff] (!%p247_p6)   ;;  %v380_v18 = vlaneseq (!%p247_p6) }
   0xb   : > { %250 = sbr.rel (%p247_p6) target bundleno = 727 (0x2d7), region = 48  ;;  %1299 = vset.pattern.permute.xlu1 (!%p247_p6), %v1412_v0  ;;  %1298 = vset.pattern.permute.xlu0 (!%p247_p6), %v1413_v1  ;;  %vm1415_vm0 = vmmov (!%p247_p6), 0   ;;  %v314_v22 = vld [vmem:[%s1775_s1] sm:$0x3] (!%p247_p6)  ;;  %vm542_vm1 = vcmask (!%p247_p6), 261120   ;;  %s278_s14 = sand.u32 (!%p247_p6), 1, %s1370_s24  }
   0xc   : > { %p286_p7 = scmp.lt.s32.totalorder (!%p247_p6), %s1486_s10, 24  ;;  %1140 = vmatprep.subr.bf16.mxu0 (!%p247_p6), %v1414_v7  ;;  %1172 = vmatprep.subr.bf16.mxu1 (!%p247_p6), %v1414_v7  ;;  %v381_v19 = vshrl.u32 (!%p247_p6), %v380_v18, 7  ;;  %v1551_v33 = vld [vmem:[%s1776_s2] ss:$0 sm:$0xff] (!%p247_p6)  ;;  %vm804_vm2 = vcmask (!%p247_p6), 15360  }
   0xd   : > { %1141 = vmatpush3.bf16.msra.mxu0 (!%p247_p6), %v1316_v6  ;;  %1144 = vmatprep.mubr.msk.bf16.mxu0 (!%p247_p6), %vm1415_vm0, %v1414_v7 }
   0xe   : > { %1142 = vmatprep.subr.bf16.mxu0 (!%p247_p6), %v1414_v7  ;;  %1176 = vmatprep.mubr.msk.bf16.mxu1 (!%p247_p6), %vm1415_vm0, %v1414_v7  ;;  %v451_v20 = vsub.s32 (!%p247_p6), 1, %v381_v19  ;;  %v382_v21 = vsub.s32 (!%p247_p6), 0, %v381_v19 }
  0x10   : > { %v1542_v24 = vrot.slane (!%p247_p6), %v314_v22, %v451_v20  ;;  %v1544_v25 = vrot.slane (!%p247_p6), %v314_v22, %v382_v21 }
  0x11   : > { %1143 = vmatpush3.bf16.msra.mxu0 (!%p247_p6), %v1317_v9 }
  0x12   : > { %s287_s11 = scalar_select %p286_p7, %s1486_s10, 24 }
  0x13   : > { %s826_s24 = ssub.s32 (%p1481_p4), 25, %s1486_s10  ;;  %s1121_s19 = smul.u32 (%p1481_p4), 104, %s1469_s27 }
  0x14   : > { %s1087_s12 = sshll.u32 %s287_s11, 3  ;;  %p827_p8 = scmp.lt.s32.totalorder (%p1481_p4), %s826_s24, 13 }
  0x15   : > { %s1495_s15 = scalar_lea.vmem %s1774_s0, %s1087_s12  ;;  %s1692_s22 = scalar_lea.vmem (%p1481_p4), %s1781_s7, %s1121_s19  }
  0x16   : > { %v301_v2 = vld [vmem:[%s1495_s15] sm:$0xff]  ;;  %v302_v3 = vld [vmem:[%s1495_s15 + $0x8] sm:$0xff]  ;;  %v303_v4 = vld [vmem:[%s1495_s15 + $0x10] sm:$0xff] }
  0x17   : > { %398 = vperm.xlu1 %1299, %v301_v2   ;;  %317 = vperm.xlu0 %1298, %v301_v2   ;;  %v304_v5 = vld [vmem:[%s1495_s15 + $0x18] sm:$0xff]  ;;  %v306_v8 = vld [vmem:[%s1495_s15 + $0x28] sm:$0xff]  ;;  %v305_v10 = vld [vmem:[%s1495_s15 + $0x20] sm:$0xff] }
  0x18   : > { %v307_v11 = vld [vmem:[%s1495_s15 + $0x30] sm:$0xff]  ;;  %v310_v12 = vld [vmem:[%s1495_s15 + $0x48] sm:$0xff]  ;;  %v308_v13 = vld [vmem:[%s1495_s15 + $0x38] sm:$0xff] }
  0x19   : > { %v311_v14 = vld [vmem:[%s1495_s15 + $0x50] sm:$0xff]  ;;  %v309_v15 = vld [vmem:[%s1495_s15 + $0x40] sm:$0xff]  ;;  %v312_v17 = vld [vmem:[%s1495_s15 + $0x58] sm:$0xff] }
  0x1a   : > { %v313_v16 = vld [vmem:[%s1495_s15 + $0x60] sm:$0xff]  ;;  %s1204_s15 = smul.u32 104, %s278_s14 }
  0x1b   : > { %402 = vperm.xlu1 %1299, %v302_v3   ;;  %1301 = vset.pattern.permute.xlu0 %v1412_v0 }
  0x1c   : > { %406 = vperm.xlu0 %1301, %v303_v4   ;;  %s1657_s18 = scalar_lea.vmem [#allocation2], %s1204_s15  }
  0x1f   : > { %1300 = vset.pattern.permute.xlu1 %v1413_v1 }
  0x20   : > { %332 = vperm.xlu1 %1300, %v304_v5   ;;  %1302 = vset.pattern.permute.xlu0 %v1413_v1 }
  0x21   : > { %322 = vperm.xlu0 %1302, %v302_v3  }
  0x24   : > { %1303 = vset.pattern.permute.xlu1 %v1412_v0 }
  0x25   : > { %410 = vperm.xlu1 %1303, %v304_v5   ;;  %327 = vperm.xlu0 %1302, %v303_v4  }
  0x29   : > { %1304 = vset.pattern.permute.xlu1 %v1413_v1  ;;  %342 = vperm.xlu0 %1302, %v306_v8  }
  0x2a   : > { %337 = vperm.xlu1 %1304, %v305_v10  }
  0x2d   : > { %1307 = vset.pattern.permute.xlu0 %v1412_v0 }
  0x2e   : > { %1305 = vset.pattern.permute.xlu1 %v1412_v0  ;;  %422 = vperm.xlu0 %1307, %v307_v11  }
  0x2f   : > { %414 = vperm.xlu1 %1305, %v305_v10  }
  0x32   : > { %1308 = vset.pattern.permute.xlu0 %v1413_v1 }
  0x33   : > { %418 = vperm.xlu1 %1305, %v306_v8   ;;  %347 = vperm.xlu0 %1308, %v307_v11  }
  0x37   : > { %1306 = vset.pattern.permute.xlu1 %v1413_v1  ;;  %362 = vperm.xlu0 %1308, %v310_v12  }
  0x38   : > { %352 = vperm.xlu1 %1306, %v308_v13  }
  0x3b   : > { %367 = vperm.xlu0 %1308, %v311_v14  }
  0x3c   : > { %1309 = vset.pattern.permute.xlu1 %v1412_v0 }
  0x3d   : > { %426 = vperm.xlu1 %1309, %v308_v13  }
  0x3f   : > { %1313 = vset.pattern.permute.xlu0 %v1412_v0 }
  0x40   : > { %438 = vperm.xlu0 %1313, %v311_v14  }
  0x41   : > { %1310 = vset.pattern.permute.xlu1 %v1413_v1 }
  0x42   : > { %357 = vperm.xlu1 %1310, %v309_v15  }
  0x44   : > { %446 = vperm.xlu0 %1313, %v313_v16  }
  0x46   : > { %1311 = vset.pattern.permute.xlu1 %v1412_v0 }
  0x47   : > { %430 = vperm.xlu1 %1311, %v309_v15  }
  0x4b   : > { %434 = vperm.xlu1 %1311, %v310_v12  }
  0x4f   : > { %1312 = vset.pattern.permute.xlu1 %v1413_v1 }
  0x50   : > { %372 = vperm.xlu1 %1312, %v312_v17  }
  0x54   : > { %1314 = vset.pattern.permute.xlu1 %v1412_v0 }
  0x55   : > { %442 = vperm.xlu1 %1314, %v312_v17  }
  0x59   : > { %1315 = vset.pattern.permute.xlu1 %v1413_v1 }
  0x5a   : > { %377 = vperm.xlu1 %1315, %v313_v16  }
  0x96   : > { %v399_v23 = vpop.permute.xlu1 %398  ;;  %v318_v26 = vpop.permute.xlu0 %317 }
  0x97   : > { %v453_v28 = vmul.f32 %v1542_v24, %v399_v23  ;;  %v384_v29 = vmul.f32 %v1544_v25, %v318_v26 }
  0x99   : > { %v466_v31 = vadd.f32 %v453_v28, %v384_v29 }
  0x9a   : > { %v403_v27 = vpop.permute.xlu1 %402 }
  0x9b   : > { %v407_v30 = vpop.permute.xlu0 %406  ;;  %v454_v35 = vmul.f32 %v1542_v24, %v403_v27  ;;  %v486_v37 = vadd.f32 %v1551_v33, %v466_v31 }
  0x9c   : > { %v455_v38 = vmul.f32 %v1542_v24, %v407_v30 }
  0x9d   : > { %v499_v46 = vmax.f32 %v486_v37, 0.0 }
  0x9f   : > { %v333_v32 = vpop.permute.xlu1 %332 }
  0xa0   : > { %v323_v34 = vpop.permute.xlu0 %322  ;;  %v387_v42 = vmul.f32 %v1544_v25, %v333_v32 }
  0xa1   : > { %v385_v36 = vmul.f32 %v1544_v25, %v323_v34 }
  0xa3   : > { %v467_v39 = vadd.f32 %v454_v35, %v385_v36 }
  0xa4   : > { %v411_v40 = vpop.permute.xlu1 %410  ;;  %v328_v41 = vpop.permute.xlu0 %327 }
  0xa5   : > { %v487_v43 = vadd.f32 %v1551_v33, %v467_v39  ;;  %v456_v44 = vmul.f32 %v1542_v24, %v411_v40  ;;  %v386_v45 = vmul.f32 %v1544_v25, %v328_v41 }
  0xa7   : > { %v500_v47 = vmax.f32 %v487_v43, 0.0  ;;  %v469_v48 = vadd.f32 %v456_v44, %v387_v42  ;;  %v468_v49 = vadd.f32 %v455_v38, %v386_v45 }
  0xa8   : > { %v343_v54 = vpop.permute.xlu0 %342 }
  0xa9   : > { %v512_v50 = vpack.c.bf16 %v500_v47, %v499_v46  ;;  %v489_v51 = vadd.f32 %v1551_v33, %v469_v48  ;;  %v488_v52 = vadd.f32 %v1551_v33, %v468_v49  ;;  %v338_v53 = vpop.permute.xlu1 %337  ;;  %v389_v0 = vmul.f32 %v1544_v25, %v343_v54 }
  0xaa   : > { %v388_v59 = vmul.f32 %v1544_v25, %v338_v53 }
  0xab   : > { %1145 = vmatmul.mubr.msk.bf16.vlgmr.msra.gmra.mrb[0].mxu0 %vm542_vm1, %v512_v50  ;;  %v502_v55 = vmax.f32 %v489_v51, 0.0  ;;  %v501_v56 = vmax.f32 %v488_v52, 0.0 }
  0xac   : > { %1148 = vmatprep.mubr.msk.bf16.mxu0 %vm1415_vm0, %v1414_v7 }
  0xad   : > { %v423_v58 = vpop.permute.xlu0 %422  ;;  %v513_v61 = vpack.c.bf16 %v502_v55, %v501_v56 }
  0xae   : > { %v415_v57 = vpop.permute.xlu1 %414  ;;  %v459_v5 = vmul.f32 %v1542_v24, %v423_v58 }
  0xaf   : > { %v457_v60 = vmul.f32 %v1542_v24, %v415_v57 }
  0xb1   : > { %v470_v62 = vadd.f32 %v457_v60, %v388_v59 }
  0xb2   : > { %v419_v63 = vpop.permute.xlu1 %418  ;;  %v348_v2 = vpop.permute.xlu0 %347 }
  0xb3   : > { %v458_v1 = vmul.f32 %v1542_v24, %v419_v63  ;;  %1149 = vmatmul.mubr.msk.bf16.gmra.mrb[4].mxu0 %vm542_vm1, %v513_v61  ;;  %v490_v3 = vadd.f32 %v1551_v33, %v470_v62  ;;  %v390_v6 = vmul.f32 %v1544_v25, %v348_v2 }
  0xb4   : > { %1152 = vmatprep.mubr.msk.bf16.mxu0 %vm1415_vm0, %v1414_v7 }
  0xb5   : > { %v471_v4 = vadd.f32 %v458_v1, %v389_v0  ;;  %v503_v10 = vmax.f32 %v490_v3, 0.0  ;;  %v472_v12 = vadd.f32 %v459_v5, %v390_v6 }
  0xb6   : > { %v363_v19 = vpop.permute.xlu0 %362 }
  0xb7   : > { %v491_v8 = vadd.f32 %v1551_v33, %v471_v4  ;;  %v353_v9 = vpop.permute.xlu1 %352  ;;  %v492_v16 = vadd.f32 %v1551_v33, %v472_v12  ;;  %v393_v34 = vmul.f32 %v1544_v25, %v363_v19 }
  0xb8   : > { %v391_v15 = vmul.f32 %v1544_v25, %v353_v9 }
  0xb9   : > { %v504_v11 = vmax.f32 %v491_v8, 0.0  ;;  %v505_v20 = vmax.f32 %v492_v16, 0.0 }
  0xba   : > { %v368_v27 = vpop.permute.xlu0 %367 }
  0xbb   : > { %v514_v13 = vpack.c.bf16 %v504_v11, %v503_v10  ;;  %v394_v39 = vmul.f32 %v1544_v25, %v368_v27 }
  0xbc   : > { %v427_v14 = vpop.permute.xlu1 %426 }
  0xbd   : > { %v460_v17 = vmul.f32 %v1542_v24, %v427_v14  ;;  %1153 = vmatmul.mubr.msk.bf16.gmra.mrb[8].mxu0 %vm542_vm1, %v514_v13 }
  0xbe   : > { %1156 = vmatprep.mubr.msk.bf16.mxu0 %vm1415_vm0, %v1414_v7 }
  0xbf   : > { %v473_v18 = vadd.f32 %v460_v17, %v391_v15  ;;  %v439_v36 = vpop.permute.xlu0 %438 }
  0xc0   : > { %v463_v40 = vmul.f32 %v1542_v24, %v439_v36 }
  0xc1   : > { %v493_v21 = vadd.f32 %v1551_v33, %v473_v18  ;;  %v358_v22 = vpop.permute.xlu1 %357 }
  0xc2   : > { %v392_v29 = vmul.f32 %v1544_v25, %v358_v22  ;;  %v476_v45 = vadd.f32 %v463_v40, %v394_v39 }
  0xc3   : > { %v506_v23 = vmax.f32 %v493_v21, 0.0  ;;  %v447_v52 = vpop.permute.xlu0 %446 }
  0xc4   : > { %v496_v50 = vadd.f32 %v1551_v33, %v476_v45  ;;  %v465_v55 = vmul.f32 %v1542_v24, %v447_v52 }
  0xc5   : > { %v515_v26 = vpack.c.bf16 %v506_v23, %v505_v20 }
  0xc6   : > { %v431_v28 = vpop.permute.xlu1 %430  ;;  %v509_v57 = vmax.f32 %v496_v50, 0.0 }
  0xc7   : > { %v461_v30 = vmul.f32 %v1542_v24, %v431_v28  ;;  %1157 = vmatmul.mubr.msk.bf16.gmra.mrb[12].mxu0 %vm542_vm1, %v515_v26 }
  0xc8   : > { %1160 = vmatprep.mubr.msk.bf16.mxu0 %vm1415_vm0, %v1414_v7 }
  0xc9   : > { %v474_v31 = vadd.f32 %v461_v30, %v392_v29 }
  0xca   : > { %v435_v32 = vpop.permute.xlu1 %434 }
  0xcb   : > { %v462_v35 = vmul.f32 %v1542_v24, %v435_v32  ;;  %v494_v37 = vadd.f32 %v1551_v33, %v474_v31 }
  0xcd   : > { %v475_v38 = vadd.f32 %v462_v35, %v393_v34  ;;  %v507_v43 = vmax.f32 %v494_v37, 0.0 }
  0xcf   : > { %v495_v41 = vadd.f32 %v1551_v33, %v475_v38  ;;  %v373_v42 = vpop.permute.xlu1 %372 }
  0xd0   : > { %v395_v48 = vmul.f32 %v1544_v25, %v373_v42 }
  0xd1   : > { %v508_v44 = vmax.f32 %v495_v41, 0.0 }
  0xd3   : > { %v516_v46 = vpack.c.bf16 %v508_v44, %v507_v43 }
  0xd4   : > { %v443_v47 = vpop.permute.xlu1 %442 }
  0xd5   : > { %v464_v49 = vmul.f32 %v1542_v24, %v443_v47  ;;  %1161 = vmatmul.mubr.msk.bf16.gmra.mrb[16].mxu0 %vm542_vm1, %v516_v46  ;;  %v1318_v24 = vld [vmem:[%s1779_s5] sm:$0xff]  }
  0xd6   : > { %1164 = vmatprep.mubr.msk.bf16.mxu0 %vm1415_vm0, %v1414_v7  ;;  %1173 = vmatpush3.bf16.msra.mxu1 %v1318_v24 }
  0xd7   : > { %v477_v51 = vadd.f32 %v464_v49, %v395_v48  ;;  %1174 = vmatprep.subr.bf16.mxu1 %v1414_v7 }
  0xd9   : > { %v497_v53 = vadd.f32 %v1551_v33, %v477_v51  ;;  %v378_v54 = vpop.permute.xlu1 %377 }
  0xda   : > { %v396_v56 = vmul.f32 %v1544_v25, %v378_v54  ;;  %v1319_v25 = vld [vmem:[%s1779_s5 + $0x8] sm:$0xff]  }
  0xdb   : > { %v510_v58 = vmax.f32 %v497_v53, 0.0  ;;  %1175 = vmatpush3.bf16.msra.mxu1 %v1319_v25  ;;  %v1099_v25 = vld [vmem:[%s1780_s6] ss:$0 sm:$0xff] }
  0xdc   : > { %v478_v59 = vadd.f32 %v465_v55, %v396_v56 }
  0xdd   : > { %v517_v60 = vpack.c.bf16 %v510_v58, %v509_v57 }
  0xde   : > { %v498_v61 = vadd.f32 %v1551_v33, %v478_v59  ;;  %v1619_v33 = vld [vmem:[%s1778_s4] ss:$0 sm:$0xff] }
  0xdf   : > { %1165 = vmatmul.mubr.msk.bf16.gmra.mrb[20].mxu0 %vm542_vm1, %v517_v60 }
  0xe0   : > { %1168 = vmatprep.mubr.msk.bf16.mxu0 %vm1415_vm0, %v1414_v7  ;;  %v511_v62 = vmax.f32 %v498_v61, 0.0 }
  0xe2   : > { %v518_v63 = vpack.c.bf16 %v511_v62, %v511_v62 }
  0xe7   : > { %1169 = vmatmul.mubr.msk.bf16.gmra.mrb[24].mxu0 %vm542_vm1, %v518_v63 }
 0x17e   : > { %v598_v0 = vpop.f32.mrb[0].mxu0 }
 0x17f   : > { %v599_v1 = vadd.f32 %v1619_v33, %v598_v0  ;;  %v1146_v2 = vpop.f32.mrb[1].mxu0 }
 0x180   : > { %v601_v3 = vpop.f32.mrb[2].mxu0 }
 0x181   : > { %v602_v4 = vadd.f32 %v1619_v33, %v601_v3  ;;  %v1147_v5 = vpop.f32.mrb[3].mxu0  ;;  %v652_v6 = vmax.f32 %v599_v1, 0.0 }
 0x183   : > { %v653_v8 = vmax.f32 %v602_v4, 0.0 }
 0x185   : > { %v665_v9 = vpack.c.bf16 %v653_v8, %v652_v6 }
 0x186   : > { %v606_v10 = vpop.f32.mrb[4].mxu0 }
 0x187   : > { %v607_v11 = vadd.f32 %v1619_v33, %v606_v10  ;;  %v1150_v12 = vpop.f32.mrb[5].mxu0  ;;  %1177 = vmatmul.mubr.msk.bf16.vlgmr.msra.gmra.mrb[0].mxu1 %vm542_vm1, %v665_v9 }
 0x188   : > { %v609_v13 = vpop.f32.mrb[6].mxu0  ;;  %1180 = vmatprep.mubr.msk.bf16.mxu1 %vm1415_vm0, %v1414_v7 }
 0x189   : > { %v610_v14 = vadd.f32 %v1619_v33, %v609_v13  ;;  %v1151_v15 = vpop.f32.mrb[7].mxu0  ;;  %v654_v16 = vmax.f32 %v607_v11, 0.0 }
 0x18b   : > { %v655_v17 = vmax.f32 %v610_v14, 0.0 }
 0x18d   : > { %v666_v18 = vpack.c.bf16 %v655_v17, %v654_v16 }
 0x18f   : > { %1181 = vmatmul.mubr.msk.bf16.gmra.mrb[4].mxu1 %vm542_vm1, %v666_v18 }
 0x190   : > { %v614_v19 = vpop.f32.mrb[8].mxu0  ;;  %1184 = vmatprep.mubr.msk.bf16.mxu1 %vm1415_vm0, %v1414_v7 }
 0x191   : > { %v615_v20 = vadd.f32 %v1619_v33, %v614_v19  ;;  %v1154_v21 = vpop.f32.mrb[9].mxu0 }
 0x192   : > { %v617_v22 = vpop.f32.mrb[10].mxu0 }
 0x193   : > { %v618_v23 = vadd.f32 %v1619_v33, %v617_v22  ;;  %v1155_v26 = vpop.f32.mrb[11].mxu0  ;;  %v656_v27 = vmax.f32 %v615_v20, 0.0 }
 0x195   : > { %v657_v28 = vmax.f32 %v618_v23, 0.0 }
 0x197   : > { %v667_v29 = vpack.c.bf16 %v657_v28, %v656_v27 }
 0x199   : > { %1185 = vmatmul.mubr.msk.bf16.gmra.mrb[8].mxu1 %vm542_vm1, %v667_v29 }
 0x19a   : > { %v622_v30 = vpop.f32.mrb[12].mxu0  ;;  %1188 = vmatprep.mubr.msk.bf16.mxu1 %vm1415_vm0, %v1414_v7 }
 0x19b   : > { %v623_v31 = vadd.f32 %v1619_v33, %v622_v30  ;;  %v1158_v32 = vpop.f32.mrb[13].mxu0 }
 0x19c   : > { %v625_v34 = vpop.f32.mrb[14].mxu0 }
 0x19d   : > { %v626_v35 = vadd.f32 %v1619_v33, %v625_v34  ;;  %v1159_v36 = vpop.f32.mrb[15].mxu0  ;;  %v658_v37 = vmax.f32 %v623_v31, 0.0 }
 0x19f   : > { %v659_v38 = vmax.f32 %v626_v35, 0.0 }
 0x1a1   : > { %v668_v39 = vpack.c.bf16 %v659_v38, %v658_v37 }
 0x1a3   : > { %1189 = vmatmul.mubr.msk.bf16.gmra.mrb[12].mxu1 %vm542_vm1, %v668_v39 }
 0x1a4   : > { %1192 = vmatprep.mubr.msk.bf16.mxu1 %vm1415_vm0, %v1414_v7 }
 0x1a8   : > { %v630_v40 = vpop.f32.mrb[16].mxu0 }
 0x1a9   : > { %v631_v41 = vadd.f32 %v1619_v33, %v630_v40  ;;  %v1162_v42 = vpop.f32.mrb[17].mxu0 }
 0x1aa   : > { %v633_v43 = vpop.f32.mrb[18].mxu0 }
 0x1ab   : > { %v634_v44 = vadd.f32 %v1619_v33, %v633_v43  ;;  %v1163_v45 = vpop.f32.mrb[19].mxu0  ;;  %v660_v46 = vmax.f32 %v631_v41, 0.0 }
 0x1ad   : > { %v661_v47 = vmax.f32 %v634_v44, 0.0 }
 0x1af   : > { %v669_v48 = vpack.c.bf16 %v661_v47, %v660_v46 }
 0x1b1   : > { %1193 = vmatmul.mubr.msk.bf16.gmra.mrb[16].mxu1 %vm542_vm1, %v669_v48 }
 0x1b2   : > { %v638_v49 = vpop.f32.mrb[20].mxu0  ;;  %1196 = vmatprep.mubr.msk.bf16.mxu1 %vm1415_vm0, %v1414_v7 }
 0x1b3   : > { %v639_v50 = vadd.f32 %v1619_v33, %v638_v49  ;;  %v1166_v51 = vpop.f32.mrb[21].mxu0 }
 0x1b4   : > { %v641_v52 = vpop.f32.mrb[22].mxu0 }
 0x1b5   : > { %v642_v53 = vadd.f32 %v1619_v33, %v641_v52  ;;  %v1167_v54 = vpop.f32.mrb[23].mxu0  ;;  %v662_v55 = vmax.f32 %v639_v50, 0.0 }
 0x1b7   : > { %v663_v56 = vmax.f32 %v642_v53, 0.0 }
 0x1b9   : > { %v670_v57 = vpack.c.bf16 %v663_v56, %v662_v55 }
 0x1ba   : > { %v646_v58 = vpop.f32.mrb[24].mxu0 }
 0x1bb   : > { %v647_v59 = vadd.f32 %v1619_v33, %v646_v58  ;;  %v1170_v60 = vpop.f32.mrb[25].mxu0  ;;  %1197 = vmatmul.mubr.msk.bf16.gmra.mrb[20].mxu1 %vm542_vm1, %v670_v57 }
 0x1bc   : > { %v649_v61 = vpop.f32.mrb[26].mxu0  ;;  %1200 = vmatprep.mubr.msk.bf16.mxu1 %vm1415_vm0, %v1414_v7 }
 0x1bd   : > { %v664_v62 = vmax.f32 %v647_v59, 0.0  ;;  %v1171_v63 = vpop.f32.mrb[27].mxu0 }
 0x1bf   : > { %v671_v24 = vpack.c.bf16 %v664_v62, %v664_v62 }
 0x1c3   : > { %1201 = vmatmul.mubr.msk.bf16.gmra.mrb[24].mxu1 %vm542_vm1, %v671_v24 }
 0x25a   : > { %v750_v0 = vpop.f32.mrb[0].mxu1 }
 0x25b   : > { %v751_v33 = vadd.f32 %v1099_v25, %v750_v0  ;;  %v1178_v1 = vpop.f32.mrb[1].mxu1 }
 0x25c   : > { %v753_v2 = vpop.f32.mrb[2].mxu1 }
 0x25d   : > { %805 = vst.msk [vmem:[%s1657_s18] sm:$0xff] %vm804_vm2, %v751_v33  ;;  %v754_v7 = vadd.f32 %v1099_v25, %v753_v2  ;;  %v1179_v3 = vpop.f32.mrb[3].mxu1 }
 0x25f   : > { %806 = vst.msk [vmem:[%s1657_s18 + $0x8] sm:$0xff] %vm804_vm2, %v754_v7 }
 0x262   : > { %v758_v4 = vpop.f32.mrb[4].mxu1 }
 0x263   : > { %v759_v5 = vadd.f32 %v1099_v25, %v758_v4  ;;  %v1182_v6 = vpop.f32.mrb[5].mxu1 }
 0x264   : > { %v761_v8 = vpop.f32.mrb[6].mxu1 }
 0x265   : > { %807 = vst.msk [vmem:[%s1657_s18 + $0x10] sm:$0xff] %vm804_vm2, %v759_v5  ;;  %v762_v9 = vadd.f32 %v1099_v25, %v761_v8  ;;  %v1183_v10 = vpop.f32.mrb[7].mxu1 }
 0x267   : > { %808 = vst.msk [vmem:[%s1657_s18 + $0x18] sm:$0xff] %vm804_vm2, %v762_v9 }
 0x26c   : > { %v766_v11 = vpop.f32.mrb[8].mxu1 }
 0x26d   : > { %v767_v12 = vadd.f32 %v1099_v25, %v766_v11  ;;  %v1186_v13 = vpop.f32.mrb[9].mxu1 }
 0x26e   : > { %v769_v14 = vpop.f32.mrb[10].mxu1 }
 0x26f   : > { %809 = vst.msk [vmem:[%s1657_s18 + $0x20] sm:$0xff] %vm804_vm2, %v767_v12  ;;  %v770_v15 = vadd.f32 %v1099_v25, %v769_v14  ;;  %v1187_v16 = vpop.f32.mrb[11].mxu1 }
 0x271   : > { %810 = vst.msk [vmem:[%s1657_s18 + $0x28] sm:$0xff] %vm804_vm2, %v770_v15 }
 0x276   : > { %v774_v17 = vpop.f32.mrb[12].mxu1 }
 0x277   : > { %v775_v18 = vadd.f32 %v1099_v25, %v774_v17  ;;  %v1190_v19 = vpop.f32.mrb[13].mxu1 }
 0x278   : > { %v777_v20 = vpop.f32.mrb[14].mxu1 }
 0x279   : > { %811 = vst.msk [vmem:[%s1657_s18 + $0x30] sm:$0xff] %vm804_vm2, %v775_v18  ;;  %v778_v21 = vadd.f32 %v1099_v25, %v777_v20  ;;  %v1191_v22 = vpop.f32.mrb[15].mxu1 }
 0x27b   : > { %812 = vst.msk [vmem:[%s1657_s18 + $0x38] sm:$0xff] %vm804_vm2, %v778_v21 }
 0x284   : > { %v782_v23 = vpop.f32.mrb[16].mxu1 }
 0x285   : > { %v783_v26 = vadd.f32 %v1099_v25, %v782_v23  ;;  %v1194_v27 = vpop.f32.mrb[17].mxu1 }
 0x286   : > { %v785_v28 = vpop.f32.mrb[18].mxu1 }
 0x287   : > { %813 = vst.msk [vmem:[%s1657_s18 + $0x40] sm:$0xff] %vm804_vm2, %v783_v26  ;;  %v786_v29 = vadd.f32 %v1099_v25, %v785_v28  ;;  %v1195_v30 = vpop.f32.mrb[19].mxu1 }
 0x289   : > { %814 = vst.msk [vmem:[%s1657_s18 + $0x48] sm:$0xff] %vm804_vm2, %v786_v29 }
 0x28e   : > { %v790_v31 = vpop.f32.mrb[20].mxu1 }
 0x28f   : > { %v791_v32 = vadd.f32 %v1099_v25, %v790_v31  ;;  %v1198_v34 = vpop.f32.mrb[21].mxu1 }
 0x290   : > { %v793_v35 = vpop.f32.mrb[22].mxu1 }
 0x291   : > { %815 = vst.msk [vmem:[%s1657_s18 + $0x50] sm:$0xff] %vm804_vm2, %v791_v32  ;;  %v794_v36 = vadd.f32 %v1099_v25, %v793_v35  ;;  %v1199_v37 = vpop.f32.mrb[23].mxu1 }
 0x293   : > { %816 = vst.msk [vmem:[%s1657_s18 + $0x58] sm:$0xff] %vm804_vm2, %v794_v36  ;;  %824 = sbr.rel (!%p1481_p4) target bundleno = 727 (0x2d7), region = 52 }
 0x296   : > { %v798_v38 = vpop.f32.mrb[24].mxu1 }
 0x297   : > { %v799_v39 = vadd.f32 %v1099_v25, %v798_v38  ;;  %v1202_v40 = vpop.f32.mrb[25].mxu1 }
 0x298   : > { %v801_v41 = vpop.f32.mrb[26].mxu1 }
 0x299   : > { %817 = vst.msk [vmem:[%s1657_s18 + $0x60] sm:$0xff] %vm804_vm2, %v799_v39  ;;  %v1203_v42 = vpop.f32.mrb[27].mxu1 }
 0x29a   : > { %s1790_s24 = smov (!%p827_p8, %s826_s24), 13 }
 0x29b   : > { %s1109_s23 = sshll.u32 %s1790_s24, 7 }
 0x29c   : > { %p1112_p9 = scmp.eq.s32.totalorder %s1109_s23, 0 }
 0x29d   : > { %1320 = sdivrem.u32 (!%p1112_p9), %s1790_s24, 13 }
 0x29e   : > { %835 = sbr.rel (%p1112_p9) target bundleno = 727 (0x2d7), region = 56 }
 0x2a6   : > { %s1698_s9 = spop.drf %1320 }
 0x2a7   : > { %p1113_p10 = scmp.le.s32.totalorder %s1698_s9, 0 }
 0x2a8   : > { %s1783_s27 = smov (!%p1113_p10), %s1692_s22  ;;  %s1784_s10 = smov (!%p1113_p10), %s1657_s18 }
 0x2a9   : > { %1039 = sbr.rel (%p1113_p10) target bundleno = 698 (0x2ba), region = 132  ;;  %s1707_s26 = smov (!%p1113_p10), 0  }
 0x2aa   : > { %s1709_s29 = smov (!%p1113_p10), 0  }
 0x2b0 LB: >> { %v923_v43 = vld [vmem:[%s1386_s10] sm:$0xff]  ;;  %v925_v44 = vld [vmem:[%s1386_s10 + $0x8] sm:$0xff]  ;;  %v927_v45 = vld [vmem:[%s1386_s10 + $0x10] sm:$0xff]  ;;  %s949_s30 = sadd.s32 1, %s1390_s26  ;;  %s917_s29 = sadd.s32 1, %s1394_s29   ;;  %s1394_s29 = sphi %s1709_s29, %s917_s29   ;;  %s1390_s26 = sphi %s1707_s26, %s1785_s26   ;;  %s1386_s10 = sphi %s1784_s10, %s954_s10   ;;  %s1382_s27 = sphi %s1783_s27, %s955_s27  }
 0x2b1   : >> { %924 = vst [vmem:[%s1382_s27] sm:$0xff] %v923_v43  ;;  %926 = vst [vmem:[%s1382_s27 + $0x8] sm:$0xff] %v925_v44  ;;  %v929_v46 = vld [vmem:[%s1386_s10 + $0x18] sm:$0xff]  ;;  %v931_v47 = vld [vmem:[%s1386_s10 + $0x20] sm:$0xff]  ;;  %p950_p11 = scmp.ge.s32.totalorder %s949_s30, %s1698_s9  ;;  %p916_p12 = scmp.ge.s32.totalorder %s917_s29, %s1698_s9 }
 0x2b2   : >> { %928 = vst [vmem:[%s1382_s27 + $0x10] sm:$0xff] %v927_v45  ;;  %v933_v48 = vld [vmem:[%s1386_s10 + $0x28] sm:$0xff]  ;;  %930 = vst [vmem:[%s1382_s27 + $0x18] sm:$0xff] %v929_v46  ;;  %v935_v49 = vld [vmem:[%s1386_s10 + $0x30] sm:$0xff] }
 0x2b3   : >> { %932 = vst [vmem:[%s1382_s27 + $0x20] sm:$0xff] %v931_v47  ;;  %934 = vst [vmem:[%s1382_s27 + $0x28] sm:$0xff] %v933_v48  ;;  %v937_v50 = vld [vmem:[%s1386_s10 + $0x38] sm:$0xff]  ;;  %v939_v51 = vld [vmem:[%s1386_s10 + $0x40] sm:$0xff]  ;;  %s1792_s30 = smov (%p950_p11, %s949_s30), 0  ;;  %919 = sbr.rel (!%p916_p12) target bundleno = 688 (0x2b0), region = 138 }
 0x2b4   : >> { %936 = vst [vmem:[%s1382_s27 + $0x30] sm:$0xff] %v935_v49  ;;  %938 = vst [vmem:[%s1382_s27 + $0x38] sm:$0xff] %v937_v50  ;;  %v941_v52 = vld [vmem:[%s1386_s10 + $0x48] sm:$0xff]  ;;  %v943_v53 = vld [vmem:[%s1386_s10 + $0x50] sm:$0xff]  ;;  %s952_s11 = smul.u32 104, %s1792_s30  ;;  %s1785_s26 = smov %s1792_s30 }
 0x2b5   : >> { %940 = vst [vmem:[%s1382_s27 + $0x40] sm:$0xff] %v939_v51  ;;  %v945_v54 = vld [vmem:[%s1386_s10 + $0x58] sm:$0xff]  ;;  %942 = vst [vmem:[%s1382_s27 + $0x48] sm:$0xff] %v941_v52  ;;  %v947_v55 = vld [vmem:[%s1386_s10 + $0x60] sm:$0xff] }
 0x2b6   : >> { %944 = vst [vmem:[%s1382_s27 + $0x50] sm:$0xff] %v943_v53  ;;  %946 = vst [vmem:[%s1382_s27 + $0x58] sm:$0xff] %v945_v54  ;;  %s954_s10 = scalar_lea.vmem %s1657_s18, %s952_s11 [#allocation2]  }
 0x2b7   : >> { %948 = vst [vmem:[%s1382_s27 + $0x60] sm:$0xff] %v947_v55  ;;  %s955_s27 = scalar_lea.vmem %s1692_s22, %s952_s11  }
 0x2ba PF: > { %1322 = sdivrem.u32 %s1790_s24, 13 }
 0x2bb   : > { %s1114_s12 = smul.u32 104, %s1698_s9 }
 0x2bd   : > { %s960_s13 = scalar_lea.vmem %s1657_s18, %s1114_s12 [#allocation2]   ;;  %s962_s14 = scalar_lea.vmem %s1692_s22, %s1114_s12  }
 0x2c3   : > { %s1323_s15 = spop.drf %1322 }
 0x2c4   : > { %p1116_p13 = scmp.le.s32.totalorder %s1323_s15, 0 }
 0x2c5   : > { %s1396_s16 = smov (!%p1116_p13), %s962_s14   ;;  %s1400_s17 = smov (!%p1116_p13), %s960_s13  }
 0x2c6   : > { %1053 = sbr.rel (%p1116_p13) target bundleno = 727 (0x2d7), region = 143  ;;  %s1404_s19 = smov (!%p1116_p13), 0  }
 0x2c7   : > { %s1408_s20 = smov (!%p1116_p13), 0  }
 0x2cd LB: >> { %v972_v56 = vld [vmem:[%s1402_s17] sm:$0xff]  ;;  %s974_s21 = sadd.s32 1, %s1406_s19  ;;  %s966_s20 = sadd.s32 1, %s1410_s20   ;;  %s1410_s20 = sphi %s1408_s20, %s966_s20   ;;  %s1406_s19 = sphi %s1404_s19, %s1405_s19   ;;  %s1402_s17 = sphi %s1400_s17, %s979_s17   ;;  %s1398_s16 = sphi %s1396_s16, %s980_s16  }
 0x2ce   : >> { %973 = vst [vmem:[%s1398_s16] sm:$0xff] %v972_v56  ;;  %p975_p0 = scmp.ge.s32.totalorder %s974_s21, %s1323_s15  ;;  %p965_p1 = scmp.ge.s32.totalorder %s966_s20, %s1323_s15 }
 0x2d0   : >> { %s1794_s21 = smov (%p975_p0, %s974_s21), 0  ;;  %968 = sbr.rel (!%p965_p1) target bundleno = 717 (0x2cd), region = 149 }
 0x2d1   : >> { %s1117_s18 = sshll.u32 %s1794_s21, 3  ;;  %s1405_s19 = smov %s1794_s21  }
 0x2d2   : >> { %s979_s17 = scalar_lea.vmem %s960_s13, %s1117_s18 [#allocation2]   ;;  %s980_s16 = scalar_lea.vmem %s962_s14, %s1117_s18  }
 0x2d7 PF: > { %p14_p2 = scmp.ge.s32.totalorder %s1471_s28, 4   ;;  %s1786_s24 = smov %s1374_s25 }
 0x2d8   : > { %s1787_s25 = smov %s1479_s8  ;;  %s1788_s26 = smov %s1471_s28 }
 0x2d9   :  { %16 = sbr.rel (!%p14_p2) target bundleno = 2 (0x2), region = 160 }

</bundles_post_ra>
